<compile_context>
chip_gen: v5e
topology: v5e:2x2
jax: 0.10.0
libtpu: 0.0.40
codegen_flags: <defaults>
</compile_context>

<pallas_src>
import functools

import jax
import jax.numpy as jnp
from jax.experimental import pallas as pl
from jax.experimental.pallas import tpu as pltpu

_NEG_INF = float("-inf")


def _round_up(x: int, m: int) -> int:
    return ((x + m - 1) // m) * m


def _round_down(x: int, m: int) -> int:
    return (x // m) * m


def _ce_single_kernel(pred_ref, tgt_ref, out_ref, *, batch: int):
    """Whole class dim in one (tb, C) tile: scratch-free single pass."""
    i = pl.program_id(0)
    tb, tc = pred_ref.shape

    pred = pred_ref[...].astype(jnp.float32)                 # in-register upcast
    col = jax.lax.broadcasted_iota(jnp.int32, (tb, tc), 1)   # local column ids

    m = jnp.max(pred, axis=-1, keepdims=True)
    l = jnp.sum(jnp.exp(pred - m), axis=-1, keepdims=True)
    t = jnp.sum(jnp.where(col == tgt_ref[...], pred, 0.0), axis=-1, keepdims=True)

    loss_rows = m + jnp.log(l) - t                           # (tb, 1)
    row_ids = i * tb + jax.lax.broadcasted_iota(jnp.int32, (tb, 1), 0)
    part = jnp.sum(jnp.where(row_ids < batch, loss_rows, 0.0),
                   axis=0, keepdims=True)                    # (1, 1)
    out_ref[...] = part.reshape(1, 1, 1)


def _ce_stream_kernel(pred_ref, tgt_ref, out_ref, m_ref, l_ref, t_ref,
                      *, batch: int, num_classes: int, col_masked: bool):
    """Online-logsumexp over (tb, tc) class tiles; class axis is the reduction."""
    i = pl.program_id(0)          # batch block
    j = pl.program_id(1)          # class block (serial reduction axis)
    nj = pl.num_programs(1)
    tb, tc = pred_ref.shape

    @pl.when(j == 0)
    def _init():
        m_ref[...] = jnp.full_like(m_ref, _NEG_INF)
        l_ref[...] = jnp.zeros_like(l_ref)
        t_ref[...] = jnp.zeros_like(t_ref)

    pred = pred_ref[...].astype(jnp.float32)                 # in-register upcast
    col = jax.lax.broadcasted_iota(jnp.int32, (tb, tc), 1)   # local column ids

    if col_masked:
        # Only compiled when the last class tile is ragged; scalar RHS compare.
        px = jnp.where(col < (num_classes - j * tc), pred, _NEG_INF)
    else:
        px = pred

    # Online logsumexp update.
    m_old = m_ref[...]
    m_new = jnp.maximum(m_old, jnp.max(px, axis=-1, keepdims=True))
    l_ref[...] = l_ref[...] * jnp.exp(m_old - m_new) + jnp.sum(
        jnp.exp(px - m_new), axis=-1, keepdims=True)
    m_ref[...] = m_new

    # Target logit: compare local column ids against the shifted target.
    local_tgt = tgt_ref[...] - j * tc                        # (tb, 1) int32
    t_ref[...] += jnp.sum(jnp.where(col == local_tgt, pred, 0.0),
                          axis=-1, keepdims=True)

    @pl.when(j == nj - 1)
    def _finalize():
        loss_rows = m_ref[...] + jnp.log(l_ref[...]) - t_ref[...]   # (tb, 1)
        row_ids = i * tb + jax.lax.broadcasted_iota(jnp.int32, (tb, 1), 0)
        part = jnp.sum(jnp.where(row_ids < batch, loss_rows, 0.0),
                       axis=0, keepdims=True)                        # (1, 1)
        out_ref[...] = part.reshape(1, 1, 1)


def cross_entropy(predictions: jax.Array, targets: jax.Array, *,
                  block_b: int = 256,
                  buffer_bytes: int = 4 * 1024 * 1024) -> jax.Array:
    """predictions: (B, C) f32/bf16 logits, targets: (B,) int class ids -> scalar f32."""
    b, c = predictions.shape

    # Keep logits in their native dtype (no HBM-doubling wrapper upcast).
    if predictions.dtype == jnp.float32:
        sublane = 8
    elif predictions.dtype == jnp.bfloat16:
        sublane = 16
    else:
        predictions = predictions.astype(jnp.float32)
        sublane = 8
    itemsize = jnp.dtype(predictions.dtype).itemsize

    # Batch tile cap: guarantee >=2 batch blocks (megacore) when b allows.
    tb_cap = b if b <= sublane else _round_up(pl.cdiv(b, 2), sublane)

    row_bytes = c * itemsize
    if sublane * row_bytes <= buffer_bytes or c <= 128:
        # Whole class dim in one tile (single-pass kernel). Size tb from the
        # VMEM-padded f32 row footprint; cap to keep intermediates small.
        tc = c
        f32_row = _round_up(c, 128) * 4
        tb = min(tb_cap, 1024,
                 max(sublane, _round_down(buffer_bytes // f32_row, sublane)))
    else:
        # Streaming kernel: class tile from a dtype-aware byte budget.
        tb = min(tb_cap, max(sublane, block_b))
        tc = max(128, _round_down(buffer_bytes // (tb * itemsize), 128))
        if c % tc != 0:
            # Prefer a 128-multiple tile that divides C exactly (mask-free path),
            # accepting at most a 2x smaller tile.
            for cand in range(tc, tc // 2, -128):
                if c % cand == 0:
                    tc = cand
                    break

    nb = pl.cdiv(b, tb)
    nc = pl.cdiv(c, tc)
    if nc == 1:
        tc = c
    col_masked = (nc > 1) and (c % tc != 0)

    tgt2d = targets.astype(jnp.int32).reshape(b, 1)
    out_shape = jax.ShapeDtypeStruct((nb, 1, 1), jnp.float32)

    if nc == 1:
        partials = pl.pallas_call(
            functools.partial(_ce_single_kernel, batch=b),
            out_shape=out_shape,
            grid=(nb,),
            in_specs=[
                pl.BlockSpec((tb, tc), lambda i: (i, 0)),   # logits tile
                pl.BlockSpec((tb, 1), lambda i: (i, 0)),    # targets column
            ],
            out_specs=pl.BlockSpec((1, 1, 1), lambda i: (i, 0, 0)),
            compiler_params=pltpu.CompilerParams(
                dimension_semantics=("parallel",),
                vmem_limit_bytes=48 * 1024 * 1024,
            ),
        )(predictions, tgt2d)
    else:
        partials = pl.pallas_call(
            functools.partial(_ce_stream_kernel, batch=b,
                              num_classes=c, col_masked=col_masked),
            out_shape=out_shape,
            grid=(nb, nc),
            in_specs=[
                pl.BlockSpec((tb, tc), lambda i, j: (i, j)),   # logits tile
                pl.BlockSpec((tb, 1), lambda i, j: (i, 0)),    # targets column
            ],
            out_specs=pl.BlockSpec((1, 1, 1), lambda i, j: (i, 0, 0)),
            scratch_shapes=[
                pltpu.VMEM((tb, 1), jnp.float32),   # running max
                pltpu.VMEM((tb, 1), jnp.float32),   # running sum-exp
                pltpu.VMEM((tb, 1), jnp.float32),   # target logit accumulator
            ],
            compiler_params=pltpu.CompilerParams(
                dimension_semantics=("parallel", "arbitrary"),
                vmem_limit_bytes=48 * 1024 * 1024,
            ),
        )(predictions, tgt2d)

    # Final mean with the true batch size (padded rows were zeroed in-kernel).
    return jnp.sum(partials[:, 0, 0]) / jnp.float32(b)


def _ref_loss(pred, tgt):
    p = pred.astype(jnp.float32)
    lse = jax.scipy.special.logsumexp(p, axis=-1)
    return jnp.mean(lse - p[jnp.arange(p.shape[0]), tgt])


if __name__ == "__main__":
    key = jax.random.PRNGKey(0)
    keys = jax.random.split(key, 10)

    # 1) small f32, single-pass path, 2 batch blocks.
    b, c = 16, 32
    pred = jax.random.normal(keys[0], (b, c), dtype=jnp.float32)
    tgt = jax.random.randint(keys[1], (b,), 0, c, dtype=jnp.int32)
    out = cross_entropy(pred, tgt)
    jax.block_until_ready(out)
    assert jnp.allclose(out, _ref_loss(pred, tgt), atol=1e-5, rtol=1e-5), out

    # 2) streaming path with a ragged (masked) last class tile.
    b, c = 24, 300
    pred = jax.random.normal(keys[2], (b, c), dtype=jnp.float32)
    tgt = jax.random.randint(keys[3], (b,), 0, c, dtype=jnp.int32)
    out = cross_entropy(pred, tgt, buffer_bytes=8 * 1024)
    jax.block_until_ready(out)
    assert jnp.allclose(out, _ref_loss(pred, tgt), atol=1e-5, rtol=1e-5), out

    # 3) streaming path, mask-free (class tile divides C).
    b, c = 16, 512
    pred = jax.random.normal(keys[4], (b, c), dtype=jnp.float32)
    tgt = jax.random.randint(keys[5], (b,), 0, c, dtype=jnp.int32)
    out = cross_entropy(pred, tgt, buffer_bytes=8 * 1024)
    jax.block_until_ready(out)
    assert jnp.allclose(out, _ref_loss(pred, tgt), atol=1e-5, rtol=1e-5), out

    # 4) bf16 logits streamed natively, upcast in-kernel.
    b, c = 16, 64
    pred = jax.random.normal(keys[6], (b, c), dtype=jnp.float32).astype(jnp.bfloat16)
    tgt = jax.random.randint(keys[7], (b,), 0, c, dtype=jnp.int32)
    out = cross_entropy(pred, tgt)
    jax.block_until_ready(out)
    assert jnp.allclose(out, _ref_loss(pred, tgt), atol=1e-4, rtol=1e-4), out

    # 5) batch not a multiple of the batch tile -> padded rows masked out.
    b, c = 20, 40
    pred = jax.random.normal(keys[8], (b, c), dtype=jnp.float32)
    tgt = jax.random.randint(keys[9], (b,), 0, c, dtype=jnp.int32)
    out = cross_entropy(pred, tgt)
    jax.block_until_ready(out)
    assert jnp.allclose(out, _ref_loss(pred, tgt), atol=1e-5, rtol=1e-5), out

    print("KERNEL_OK")
</pallas_src>

<mosaic_0001>
module attributes {stable_mosaic.version = 11 : i64} {
  func.func @_ce_single_kernel(%arg0: i32, %arg1: memref<8x32xf32, #tpu.memory_space<vmem>>, %arg2: memref<8x1xi32, #tpu.memory_space<vmem>>, %arg3: memref<1x1x1xf32, #tpu.memory_space<vmem>>) attributes {dimension_semantics = [#tpu.dimension_semantics<parallel>], iteration_bounds = array<i64: 2>, scalar_prefetch = 0 : i64, scratch_operands = 0 : i64, tpu.core_type = #tpu.core_type<tc>, window_params = [{transform_indices = @transform_0, window_bounds = array<i64: 8, 32>}, {transform_indices = @transform_1, window_bounds = array<i64: 8, 1>}, {transform_indices = @transform_2, window_bounds = array<i64: 1, 1, 1>}]} {
    %c0 = arith.constant 0 : index
    %c0_0 = arith.constant 0 : index
    %0 = vector.load %arg1[%c0, %c0_0] : memref<8x32xf32, #tpu.memory_space<vmem>>, vector<8x32xf32>
    %1 = tpu.iota {dimensions = array<i32: 1>} : vector<8x32xi32>
    %cst = arith.constant dense<0xFF800000> : vector<8xf32>
    %2 = vector.multi_reduction <maximumf>, %0, %cst [1] : vector<8x32xf32> to vector<8xf32>
    %3 = vector.shape_cast %2 : vector<8xf32> to vector<8x1xf32>
    %4 = vector.broadcast %3 : vector<8x1xf32> to vector<8x32xf32>
    %5 = arith.subf %0, %4 : vector<8x32xf32>
    %6 = math.exp %5 : vector<8x32xf32>
    %cst_1 = arith.constant dense<0.000000e+00> : vector<8xf32>
    %7 = vector.multi_reduction <add>, %6, %cst_1 [1] : vector<8x32xf32> to vector<8xf32>
    %8 = vector.shape_cast %7 : vector<8xf32> to vector<8x1xf32>
    %c0_2 = arith.constant 0 : index
    %c0_3 = arith.constant 0 : index
    %9 = vector.load %arg2[%c0_2, %c0_3] : memref<8x1xi32, #tpu.memory_space<vmem>>, vector<8x1xi32>
    %10 = vector.broadcast %9 : vector<8x1xi32> to vector<8x32xi32>
    %11 = arith.cmpi eq, %1, %10 : vector<8x32xi32>
    %cst_4 = arith.constant 0.000000e+00 : f32
    %12 = vector.broadcast %cst_4 : f32 to vector<8x32xf32>
    %13 = arith.select %11, %0, %12 : vector<8x32xi1>, vector<8x32xf32>
    %cst_5 = arith.constant dense<0.000000e+00> : vector<8xf32>
    %14 = vector.multi_reduction <add>, %13, %cst_5 [1] : vector<8x32xf32> to vector<8xf32>
    %15 = vector.shape_cast %14 : vector<8xf32> to vector<8x1xf32>
    %16 = math.log %8 : vector<8x1xf32>
    %17 = arith.addf %3, %16 : vector<8x1xf32>
    %18 = arith.subf %17, %15 : vector<8x1xf32>
    %c8_i32 = arith.constant 8 : i32
    %19 = arith.muli %arg0, %c8_i32 : i32
    %20 = tpu.iota {dimensions = array<i32: 0>} : vector<8x1xi32>
    %21 = vector.broadcast %19 : i32 to vector<8x1xi32>
    %22 = arith.addi %21, %20 : vector<8x1xi32>
    %c16_i32 = arith.constant 16 : i32
    %23 = vector.broadcast %c16_i32 : i32 to vector<8x1xi32>
    %24 = arith.cmpi slt, %22, %23 : vector<8x1xi32>
    %cst_6 = arith.constant 0.000000e+00 : f32
    %25 = vector.broadcast %cst_6 : f32 to vector<8x1xf32>
    %26 = arith.select %24, %18, %25 : vector<8x1xi1>, vector<8x1xf32>
    %cst_7 = arith.constant dense<0.000000e+00> : vector<1xf32>
    %27 = vector.multi_reduction <add>, %26, %cst_7 [0] : vector<8x1xf32> to vector<1xf32>
    %28 = vector.shape_cast %27 : vector<1xf32> to vector<1x1xf32>
    %29 = vector.shape_cast %28 : vector<1x1xf32> to vector<1x1x1xf32>
    %c0_8 = arith.constant 0 : index
    %c0_9 = arith.constant 0 : index
    %c0_10 = arith.constant 0 : index
    %30 = vector.load %arg3[%c0_8, %c0_9, %c0_10] : memref<1x1x1xf32, #tpu.memory_space<vmem>>, vector<1x1x1xf32>
    tpu.vector_store %arg3[%c0_8, %c0_9, %c0_10], %29 {strides = array<i32>} : memref<1x1x1xf32, #tpu.memory_space<vmem>>, vector<1x1x1xf32>,
    return
  }
  func.func @transform_0(%arg0: i32) -> (i32, i32) {
    %c0_i32 = arith.constant 0 : i32
    %c0_i32_0 = arith.constant 0 : i32
    return %arg0, %c0_i32 : i32, i32
  }
  func.func @transform_1(%arg0: i32) -> (i32, i32) {
    %c0_i32 = arith.constant 0 : i32
    %c0_i32_0 = arith.constant 0 : i32
    return %arg0, %c0_i32 : i32, i32
  }
  func.func @transform_2(%arg0: i32) -> (i32, i32, i32) {
    %c0_i32 = arith.constant 0 : i32
    %c0_i32_0 = arith.constant 0 : i32
    %c0_i32_1 = arith.constant 0 : i32
    return %arg0, %c0_i32, %c0_i32_0 : i32, i32, i32
  }
}

</mosaic_0001>

<bundles_post_ra>
// kernel: tpu_custom_call.1
= control target key start
LH: loop header
LB: loop body
LE: loop exit
PB: predicated region body
PF: predicated region fallthrough
CT: control target
= control target key end

     0   :  { %s302_s9 = smov 0   ;;  %s334_s0 = inlined_call_operand.vmem [shape: f32[16,32], index: 0, kind: input, shape index: {}]   ;;  %s335_s1 = inlined_call_operand.vmem [shape: s32[16,1], index: 1, kind: input, shape index: {}]   ;;  %s336_s2 = inlined_call_operand.vmem [shape: f32[2,1,1], index: 2, kind: output, shape index: {}]  }
   0x1 LB: > { %s308_s10 = sadd.s32 4294967295, %s284_s9   ;;  %p258_p0 = scmp.ge.s32.totalorder %s284_s9, 1  ;;  %s284_s9 = sphi %s302_s9, %s12_s9  }
   0x2   : > { %p120_p1 = scmp.lt.s32.totalorder %s284_s9, 3 }
   0x4   : > { %p121_p2 = pnand %p258_p0, %p120_p1 }
   0x5   : > { %p143_p3 = scmp.lt.s32.totalorder (!%p121_p2), %s308_s10, 1  ;;  %s261_s19 = sshll.u32 (!%p121_p2), %s308_s10, 3 }
   0x6   : > { %124 = sbr.rel (%p121_p2) target bundleno = 288 (0x120), region = 28 }
   0xb   : > { %v286_v0 = vmov 0   ;;  %s314_s11 = scalar_select %p143_p3, %s308_s10, 1  ;;  %vm157_vm0 = vcmask 261120   ;;  %v155_v9 = vlaneseq  ;;  %v183_v16 = vstv %s261_s19 }
   0xc   : > { %273 = vset.pattern.permute.xlu0 %v286_v0  ;;  %vm193_vm3 = vcmask 0  }
   0xd   : > { %s259_s12 = sshll.u32 %s314_s11, 3  ;;  %v156_v10 = vand.u32 127, %v155_v9  ;;  %v182_v15 = vshrl.u32 %v155_v9, 7  ;;  %s153_s22 = scalar_lea.vmem %s336_s2, %s314_s11 }
   0xe   : > { %s146_s15 = scalar_lea.vmem %s334_s0, %s259_s12  ;;  %s150_s18 = scalar_lea.vmem %s335_s1, %s259_s12 }
   0xf   : > { %v154_v1 = vld [vmem:[%s146_s15] sm:$0xff]  ;;  %v184_v18 = vadd.s32 %v183_v16, %v182_v15 }
  0x10   : > { %v158_v2 = vsel %vm157_vm0, %v154_v1, -inf  ;;  %v167_v3 = vld [vmem:[%s150_s18] sm:$0xff] }
  0x11   : > { %159 = vmax.xlane.f32.xlu0 %v158_v2  ;;  %vm185_vm2 = vcmp.lt.s32.totalorder %v184_v18, 16 }
  0x25   : > { %169 = vperm.xlu0 %273, %v167_v3  }
  0x84   : > { %v160_v4 = vpop.xlane.xlu0 %159 }
  0x85   : > { %v161_v5 = vsub.f32 %v154_v1, %v160_v4 }
  0x87   : > { %v162_v6 = vmul.f32 1.442695, %v161_v5 }
  0x89   : > { %274 = vpow2.f32 %v162_v6 }
  0x8f   : > { %v275_v7 = vpop.eup %274 }
  0x90   : > { %v164_v8 = vsel %vm157_vm0, %v275_v7, 0.0 }
  0x91   : > { %165 = vadd.xlane.f32.xlu1 %v164_v8 }
  0x97   : > { %v170_v11 = vpop.permute.xlu0 %169 }
  0x98   : > { %vm171_vm1 = vcmp.eq.s32.totalorder %v156_v10, %v170_v11 }
  0x99   : > { %v172_v12 = vsel %vm171_vm1, %v154_v1, 0.0 }
  0x9a   : > { %v173_v13 = vsel %vm157_vm0, %v172_v12, 0.0 }
  0x9b   : > { %174 = vadd.xlane.f32.xlu1 %v173_v13 }
 0x104   : > { %v166_v14 = vpop.xlane.xlu1 %165 }
 0x105   : > { %276 = vlog2.f32 %v166_v14 }
 0x10b   : > { %v277_v17 = vpop.eup %276 }
 0x10c   : > { %v177_v19 = vmul.f32 0.6931472, %v277_v17 }
 0x10e   : > { %v178_v20 = vadd.f32 %v177_v19, %v160_v4  ;;  %v175_v21 = vpop.xlane.xlu1 %174 }
 0x110   : > { %v179_v22 = vsub.f32 %v178_v20, %v175_v21 }
 0x112   : > { %v186_v23 = vsel %vm185_vm2, %v179_v22, 0.0 }
 0x113   : > { %v187_v24 = vrot.slane %v186_v23, 4 }
 0x115   : > { %v188_v25 = vadd.f32 %v187_v24, %v186_v23 }
 0x117   : > { %v189_v26 = vrot.slane %v188_v25, 2 }
 0x119   : > { %v190_v27 = vadd.f32 %v189_v26, %v188_v25 }
 0x11b   : > { %v191_v28 = vrot.slane %v190_v27, 1 }
 0x11d   : > { %v192_v29 = vadd.f32 %v191_v28, %v190_v27 }
 0x11f   : > { %194 = vst.msk [vmem:[%s153_s22] sm:$0x1] %vm193_vm3, %v192_v29 }
 0x120 PF: > { %s12_s9 = sadd.s32 1, %s284_s9  }
 0x121   : > { %p9_p4 = scmp.ge.s32.totalorder %s12_s9, 4  }
 0x123   :  { %11 = sbr.rel (!%p9_p4) target bundleno = 1 (0x1), region = 61 }

</bundles_post_ra>
